<compile_context>
chip_gen: v6e
topology: v6e:2x2x1
jax: 0.10.0
libtpu: 0.0.40
codegen_flags: <defaults>
</compile_context>

<pallas_src>
import functools
import math

import jax
import jax.numpy as jnp
from jax import lax
from jax.experimental import pallas as pl
from jax.experimental.pallas import tpu as pltpu


def _encoder_layer_kernel(
    # inputs
    x_ref, mask_ref,
    gamma_ref, beta_ref,
    wq_ref, wk_ref, wv_ref, wo_ref,
    w1_ref, b1_ref, w2_ref, b2_ref,
    # outputs
    out_ref,
    # scratch (persistent across grid steps)
    k_cache, v_cache,
    *, eps, block_q,
):
  f32 = jnp.float32
  cdt = wq_ref.dtype                       # MXU operand dtype (bf16)
  n_head = wq_ref.shape[0]
  S, D = x_ref.shape[1], x_ref.shape[2]
  qi = pl.program_id(1)

  gamma = gamma_ref[...].astype(f32)       # (1, D)
  beta = beta_ref[...].astype(f32)         # (1, D)

  def layer_norm(t):
    # torch semantics: unbiased std (D-1) and (std + eps) denominator.
    mean = jnp.mean(t, axis=-1, keepdims=True)
    var = jnp.sum((t - mean) ** 2, axis=-1, keepdims=True) * (1.0 / (D - 1))
    # Exact reciprocal here (LN error feeds residuals + FFN); approx reciprocal
    # is used only for the softmax denominator below.
    return gamma * ((t - mean) / (jnp.sqrt(var) + eps)) + beta

  # ---- K/V path: once per batch row, reused by all query tiles --------------
  @pl.when(qi == 0)
  def _():
    hkv = layer_norm(x_ref[0].astype(f32)).astype(cdt)          # (S, D)

    def proj(h, carry):
      k_cache[h] = jnp.dot(hkv, wk_ref[h],
                           preferred_element_type=f32).astype(cdt)   # (S, d_k)
      v_cache[h] = jnp.dot(hkv, wv_ref[h],
                           preferred_element_type=f32).astype(cdt)   # (S, d_k)
      return carry

    lax.fori_loop(0, n_head, proj, 0)

  # ---- self-attention sublayer (this query tile) -----------------------------
  row0 = pl.multiple_of(qi * block_q, block_q)
  xq = x_ref[0, pl.ds(row0, block_q), :].astype(f32)            # (TQ, D) raw rows
  hq = layer_norm(xq).astype(cdt)                               # (TQ, D) bf16

  mask = mask_ref[0, 0]                                         # (1, S)
  neg_mask = jnp.where(mask == 0.0, -1.0e9, 0.0).astype(f32)    # additive mask

  nt = (((1,), (1,)), ((), ()))            # q @ k.T without materializing k.T

  def head_body(h, sa):
    # 1/sqrt(d_k) already folded into wq in the wrapper.
    q_h = jnp.dot(hq, wq_ref[h], preferred_element_type=f32).astype(cdt)  # (TQ, d_k)
    logits = lax.dot_general(q_h, k_cache[h], nt,
                             preferred_element_type=f32)                  # (TQ, S)
    logits = logits + neg_mask
    m = jnp.max(logits, axis=-1, keepdims=True)
    e = jnp.exp(logits - m)
    p = e * pl.reciprocal(jnp.sum(e, axis=-1, keepdims=True), approx=True)
    o_h = jnp.dot(p.astype(cdt), v_cache[h],
                  preferred_element_type=f32)                             # (TQ, d_k)
    # Accumulate each head straight through its Wo slice (no concat scratch).
    return sa + jnp.dot(o_h.astype(cdt), wo_ref[h], preferred_element_type=f32)

  sa = lax.fori_loop(0, n_head, head_body, jnp.zeros((block_q, D), f32))
  x1 = xq + sa                              # dropout == identity (eval mode)

  # ---- feed-forward sublayer --------------------------------------------------
  h2 = layer_norm(x1).astype(cdt)
  ff = jnp.dot(h2, w1_ref[...], preferred_element_type=f32) + b1_ref[...]
  ff = jnp.maximum(ff, 0.0)                 # NOTE: keep f32 (v5e has no bf16 VPU)
  ff = jnp.dot(ff.astype(cdt), w2_ref[...], preferred_element_type=f32) + b2_ref[...]
  out_ref[0] = (x1 + ff).astype(out_ref.dtype)


def encoder_layer(x, src_mask, params, *, n_head, block_q=None,
                  compute_dtype=jnp.bfloat16):
  """x: (B, S, D)   src_mask: (B, 1, 1, S)   params: f32, pre-transposed to (in, out)."""
  B, S, D = x.shape
  assert D % n_head == 0
  d_k = D // n_head
  d_ff = params["w1_t"].shape[1]

  # Generation-aware tile size / VMEM limit (64-MiB parts vs 128-MiB parts).
  try:
    vmem_cap = int(pltpu.get_tpu_info().vmem_capacity_bytes)
  except Exception:
    vmem_cap = 128 * 1024 * 1024
  if block_q is None:
    block_q = 256 if vmem_cap <= 64 * 1024 * 1024 else 512
  vmem_limit = min(int(vmem_cap * 0.85), 112 * 1024 * 1024)

  # Query tiling (falls back to a single tile for small / ragged S).
  tq = block_q if (block_q <= S and S % block_q == 0) else S
  nq = S // tq

  inv_scale = 1.0 / math.sqrt(d_k)
  # Head-split, bf16 weights; 1/sqrt(d_k) folded into Wq.
  wq3 = (params["wq_t"] * inv_scale).reshape(D, n_head, d_k).transpose(1, 0, 2)
  wq3 = wq3.astype(compute_dtype)                                   # (H, D, d_k)
  wk3 = params["wk_t"].reshape(D, n_head, d_k).transpose(1, 0, 2).astype(compute_dtype)
  wv3 = params["wv_t"].reshape(D, n_head, d_k).transpose(1, 0, 2).astype(compute_dtype)
  wo3 = params["wo_t"].reshape(n_head, d_k, D).astype(compute_dtype)  # (H, d_k, D)
  w1 = params["w1_t"].astype(compute_dtype)
  w2 = params["w2_t"].astype(compute_dtype)
  gamma = params["gamma"].astype(jnp.float32)
  beta = params["beta"].astype(jnp.float32)
  b1 = params["b1"].astype(jnp.float32)
  b2 = params["b2"].astype(jnp.float32)
  x_in = x.astype(compute_dtype)            # bf16 activations over the wire

  kernel = functools.partial(_encoder_layer_kernel, eps=1e-6, block_q=tq)

  def rep(shape):
    # Grid-invariant block (weights / LN params / biases): same block every
    # step; request single buffering so it is not double-buffered in VMEM.
    idx = lambda b, q, _n=len(shape): (0,) * _n
    try:
      return pl.BlockSpec(shape, idx,
                          pipeline_mode=pl.Buffered(buffer_count=1))
    except (AttributeError, TypeError, ValueError):
      return pl.BlockSpec(shape, idx)

  in_specs = [
      pl.BlockSpec((1, S, D), lambda b, q: (b, 0, 0)),         # x (full seq, bf16)
      pl.BlockSpec((1, 1, 1, S), lambda b, q: (b, 0, 0, 0)),   # src_mask
      rep((1, D)), rep((1, D)),                                # gamma, beta
      rep((n_head, D, d_k)),                                   # Wq (scaled)
      rep((n_head, D, d_k)),                                   # Wk
      rep((n_head, D, d_k)),                                   # Wv
      rep((n_head, d_k, D)),                                   # Wo
      rep((D, d_ff)), rep((1, d_ff)),                          # W1, b1
      rep((d_ff, D)), rep((1, D)),                             # W2, b2
  ]
  out_specs = pl.BlockSpec((1, tq, D), lambda b, q: (b, q, 0))

  fn = pl.pallas_call(
      kernel,
      out_shape=jax.ShapeDtypeStruct((B, S, D), x.dtype),
      grid_spec=pltpu.PrefetchScalarGridSpec(
          num_scalar_prefetch=0,
          grid=(B, nq),
          in_specs=in_specs,
          out_specs=out_specs,
          scratch_shapes=[
              pltpu.VMEM((n_head, S, d_k), compute_dtype),     # K cache (per b)
              pltpu.VMEM((n_head, S, d_k), compute_dtype),     # V cache (per b)
          ],
      ),
      compiler_params=pltpu.CompilerParams(
          # q axis MUST be "arbitrary": the K/V cache is initialized at q == 0.
          dimension_semantics=("parallel", "arbitrary"),
          vmem_limit_bytes=vmem_limit,
      ),
  )
  return fn(x_in, src_mask, gamma, beta, wq3, wk3, wv3, wo3, w1, b1, w2, b2)


# --------------------- reference (plain JAX, f32, eval mode) ---------------------
def _ref_encoder_layer(x, src_mask, params, *, n_head):
  B, S, D = x.shape
  d_k = D // n_head
  eps = 1e-6
  gamma, beta = params["gamma"], params["beta"]

  def ln(t):
    mean = jnp.mean(t, axis=-1, keepdims=True)
    var = jnp.sum((t - mean) ** 2, axis=-1, keepdims=True) / (D - 1)
    return gamma * (t - mean) / (jnp.sqrt(var) + eps) + beta

  def mha(h):
    Q = (h @ params["wq_t"]).reshape(B, S, n_head, d_k).transpose(0, 2, 1, 3)
    K = (h @ params["wk_t"]).reshape(B, S, n_head, d_k).transpose(0, 2, 1, 3)
    V = (h @ params["wv_t"]).reshape(B, S, n_head, d_k).transpose(0, 2, 1, 3)
    logits = jnp.einsum("bhqd,bhkd->bhqk", Q, K) / math.sqrt(d_k)
    logits = jnp.where(src_mask == 0.0, -1.0e9, logits)
    p = jax.nn.softmax(logits, axis=-1)
    o = jnp.einsum("bhqk,bhkd->bhqd", p, V)
    return o.transpose(0, 2, 1, 3).reshape(B, S, D) @ params["wo_t"]

  x = x + mha(ln(x))
  h = ln(x)
  ff = jnp.maximum(h @ params["w1_t"] + params["b1"], 0.0) @ params["w2_t"] + params["b2"]
  return x + ff


if __name__ == "__main__":
  B, S = 2, 8
  d_model, n_head, d_ff = 32, 4, 64

  key = jax.random.PRNGKey(0)
  ks = jax.random.split(key, 10)

  def w(k, shape, scale=0.05):
    return (scale * jax.random.normal(k, shape)).astype(jnp.float32)

  # Weights stored PyTorch-style (out, in), then transposed to (in, out).
  params = {
      "gamma": jnp.ones((1, d_model), jnp.float32),
      "beta": jnp.zeros((1, d_model), jnp.float32),
      "wq_t": w(ks[0], (d_model, d_model)).T,
      "wk_t": w(ks[1], (d_model, d_model)).T,
      "wv_t": w(ks[2], (d_model, d_model)).T,
      "wo_t": w(ks[3], (d_model, d_model)).T,
      "w1_t": w(ks[4], (d_ff, d_model)).T,
      "b1": w(ks[5], (1, d_ff)),
      "w2_t": w(ks[6], (d_model, d_ff)).T,
      "b2": w(ks[7], (1, d_model)),
  }

  # bf16-representable input: the kernel's wrapper-side bf16 cast is lossless,
  # so the reference sees the identical effective input.
  x = w(ks[8], (B, S, d_model), scale=1.0).astype(jnp.bfloat16).astype(jnp.float32)
  # padding mask: full visibility, except the last key position of batch 1.
  src_mask = jnp.ones((B, 1, 1, S), jnp.float32).at[1, 0, 0, S - 1].set(0.0)

  out = encoder_layer(x, src_mask, params, n_head=n_head)
  out = jax.block_until_ready(out)

  ref = _ref_encoder_layer(x, src_mask, params, n_head=n_head)
  assert out.shape == (B, S, d_model)
  # bf16 MXU operands + approx softmax reciprocal vs a pure-f32 reference.
  assert jnp.allclose(out, ref, atol=2e-2, rtol=2e-2), \
      float(jnp.max(jnp.abs(out - ref)))

  print("KERNEL_OK")
</pallas_src>

<mosaic_0001>
module attributes {stable_mosaic.version = 11 : i64} {
  func.func @_encoder_layer_kernel(%arg0: i32, %arg1: i32, %arg2: memref<1x8x32xbf16, #tpu.memory_space<vmem>>, %arg3: memref<1x1x1x8xf32, #tpu.memory_space<vmem>>, %arg4: memref<1x32xf32, #tpu.memory_space<vmem>>, %arg5: memref<1x32xf32, #tpu.memory_space<vmem>>, %arg6: memref<4x32x8xbf16, #tpu.memory_space<vmem>>, %arg7: memref<4x32x8xbf16, #tpu.memory_space<vmem>>, %arg8: memref<4x32x8xbf16, #tpu.memory_space<vmem>>, %arg9: memref<4x8x32xbf16, #tpu.memory_space<vmem>>, %arg10: memref<32x64xbf16, #tpu.memory_space<vmem>>, %arg11: memref<1x64xf32, #tpu.memory_space<vmem>>, %arg12: memref<64x32xbf16, #tpu.memory_space<vmem>>, %arg13: memref<1x32xf32, #tpu.memory_space<vmem>>, %arg14: memref<1x8x32xf32, #tpu.memory_space<vmem>>, %arg15: memref<4x8x8xbf16, #tpu.memory_space<vmem>>, %arg16: memref<4x8x8xbf16, #tpu.memory_space<vmem>>) attributes {dimension_semantics = [#tpu.dimension_semantics<parallel>, #tpu.dimension_semantics<arbitrary>], iteration_bounds = array<i64: 2, 1>, scalar_prefetch = 0 : i64, scratch_operands = 2 : i64, tpu.core_type = #tpu.core_type<tc>, window_params = [{transform_indices = @transform_0, window_bounds = array<i64: 1, 8, 32>}, {transform_indices = @transform_1, window_bounds = array<i64: 1, 1, 1, 8>}, {pipeline_mode = #tpu.pipeline_mode<synchronous>, transform_indices = @transform_2, window_bounds = array<i64: 1, 32>}, {pipeline_mode = #tpu.pipeline_mode<synchronous>, transform_indices = @transform_3, window_bounds = array<i64: 1, 32>}, {pipeline_mode = #tpu.pipeline_mode<synchronous>, transform_indices = @transform_4, window_bounds = array<i64: 4, 32, 8>}, {pipeline_mode = #tpu.pipeline_mode<synchronous>, transform_indices = @transform_5, window_bounds = array<i64: 4, 32, 8>}, {pipeline_mode = #tpu.pipeline_mode<synchronous>, transform_indices = @transform_6, window_bounds = array<i64: 4, 32, 8>}, {pipeline_mode = #tpu.pipeline_mode<synchronous>, transform_indices = @transform_7, window_bounds = array<i64: 4, 8, 32>}, {pipeline_mode = #tpu.pipeline_mode<synchronous>, transform_indices = @transform_8, window_bounds = array<i64: 32, 64>}, {pipeline_mode = #tpu.pipeline_mode<synchronous>, transform_indices = @transform_9, window_bounds = array<i64: 1, 64>}, {pipeline_mode = #tpu.pipeline_mode<synchronous>, transform_indices = @transform_10, window_bounds = array<i64: 64, 32>}, {pipeline_mode = #tpu.pipeline_mode<synchronous>, transform_indices = @transform_11, window_bounds = array<i64: 1, 32>}, {transform_indices = @transform_12, window_bounds = array<i64: 1, 8, 32>}]} {
    %c0 = arith.constant 0 : index
    %c0_0 = arith.constant 0 : index
    %0 = vector.load %arg4[%c0, %c0_0] : memref<1x32xf32, #tpu.memory_space<vmem>>, vector<1x32xf32>
    %c0_1 = arith.constant 0 : index
    %c0_2 = arith.constant 0 : index
    %1 = vector.load %arg5[%c0_1, %c0_2] : memref<1x32xf32, #tpu.memory_space<vmem>>, vector<1x32xf32>
    %c0_i32 = arith.constant 0 : i32
    %2 = arith.cmpi eq, %arg1, %c0_i32 : i32
    %3 = arith.extui %2 : i1 to i32
    %c0_i32_3 = arith.constant 0 : i32
    %4 = arith.cmpi ne, %3, %c0_i32_3 : i32
    scf.if %4 {
      %c0_39 = arith.constant 0 : index
      %c0_40 = arith.constant 0 : index
      %c0_41 = arith.constant 0 : index
      %85 = vector.load %arg2[%c0_39, %c0_40, %c0_41] : memref<1x8x32xbf16, #tpu.memory_space<vmem>>, vector<1x8x32xbf16>
      %86 = vector.shape_cast %85 : vector<1x8x32xbf16> to vector<8x32xbf16>
      %87 = arith.extf %86 : vector<8x32xbf16> to vector<8x32xf32>
      %cst_42 = arith.constant dense<0.000000e+00> : vector<8xf32>
      %88 = vector.multi_reduction <add>, %87, %cst_42 [1] : vector<8x32xf32> to vector<8xf32>
      %89 = vector.shape_cast %88 : vector<8xf32> to vector<8x1xf32>
      %cst_43 = arith.constant 3.200000e+01 : f32
      %90 = vector.broadcast %cst_43 : f32 to vector<8x1xf32>
      %91 = arith.divf %89, %90 : vector<8x1xf32>
      %92 = vector.broadcast %91 : vector<8x1xf32> to vector<8x32xf32>
      %93 = arith.subf %87, %92 : vector<8x32xf32>
      %94 = arith.mulf %93, %93 : vector<8x32xf32>
      %cst_44 = arith.constant dense<0.000000e+00> : vector<8xf32>
      %95 = vector.multi_reduction <add>, %94, %cst_44 [1] : vector<8x32xf32> to vector<8xf32>
      %96 = vector.shape_cast %95 : vector<8xf32> to vector<8x1xf32>
      %cst_45 = arith.constant 0.0322580636 : f32
      %97 = vector.broadcast %cst_45 : f32 to vector<8x1xf32>
      %98 = arith.mulf %96, %97 : vector<8x1xf32>
      %99 = vector.broadcast %91 : vector<8x1xf32> to vector<8x32xf32>
      %100 = arith.subf %87, %99 : vector<8x32xf32>
      %101 = math.sqrt %98 : vector<8x1xf32>
      %cst_46 = arith.constant 9.99999997E-7 : f32
      %102 = vector.broadcast %cst_46 : f32 to vector<8x1xf32>
      %103 = arith.addf %101, %102 : vector<8x1xf32>
      %104 = vector.broadcast %103 : vector<8x1xf32> to vector<8x32xf32>
      %105 = arith.divf %100, %104 : vector<8x32xf32>
      %106 = vector.broadcast %0 : vector<1x32xf32> to vector<8x32xf32>
      %107 = arith.mulf %106, %105 : vector<8x32xf32>
      %108 = vector.broadcast %1 : vector<1x32xf32> to vector<8x32xf32>
      %109 = arith.addf %107, %108 : vector<8x32xf32>
      %110 = arith.truncf %109 : vector<8x32xf32> to vector<8x32xbf16>
      %c0_i32_47 = arith.constant 0 : i32
      %c4_i32_48 = arith.constant 4 : i32
      %111 = arith.addi %c0_i32_47, %c4_i32_48 : i32
      %c1_i32_49 = arith.constant 1 : i32
      scf.for %arg17 = %c0_i32_47 to %111 step %c1_i32_49  : i32 {
        %112 = arith.index_cast %arg17 : i32 to index
        %c0_51 = arith.constant 0 : index
        %c0_52 = arith.constant 0 : index
        %113 = vector.load %arg7[%112, %c0_51, %c0_52] : memref<4x32x8xbf16, #tpu.memory_space<vmem>>, vector<1x32x8xbf16>
        %114 = vector.shape_cast %113 : vector<1x32x8xbf16> to vector<32x8xbf16>
        %cst_53 = arith.constant dense<0.000000e+00> : vector<8x8xf32>
        %115 = tpu.matmul %110, %114, %cst_53 {dimension_numbers = #tpu.dot_dimension_numbers<[1], [0], [0], [1], [0, 0, 1, 1], [], []>} : vector<8x32xbf16>, vector<32x8xbf16>, vector<8x8xf32> -> vector<8x8xf32>
        %116 = arith.truncf %115 : vector<8x8xf32> to vector<8x8xbf16>
        %117 = arith.index_cast %arg17 : i32 to index
        %c0_54 = arith.constant 0 : index
        %c0_55 = arith.constant 0 : index
        %118 = vector.load %arg15[%117, %c0_54, %c0_55] : memref<4x8x8xbf16, #tpu.memory_space<vmem>>, vector<1x8x8xbf16>
        %119 = vector.shape_cast %118 : vector<1x8x8xbf16> to vector<8x8xbf16>
        %120 = vector.shape_cast %116 : vector<8x8xbf16> to vector<1x8x8xbf16>
        tpu.vector_store %arg15[%117, %c0_54, %c0_55], %120 {strides = array<i32>} : memref<4x8x8xbf16, #tpu.memory_space<vmem>>, vector<1x8x8xbf16>,
        %121 = arith.index_cast %arg17 : i32 to index
        %c0_56 = arith.constant 0 : index
        %c0_57 = arith.constant 0 : index
        %122 = vector.load %arg8[%121, %c0_56, %c0_57] : memref<4x32x8xbf16, #tpu.memory_space<vmem>>, vector<1x32x8xbf16>
        %123 = vector.shape_cast %122 : vector<1x32x8xbf16> to vector<32x8xbf16>
        %cst_58 = arith.constant dense<0.000000e+00> : vector<8x8xf32>
        %124 = tpu.matmul %110, %123, %cst_58 {dimension_numbers = #tpu.dot_dimension_numbers<[1], [0], [0], [1], [0, 0, 1, 1], [], []>} : vector<8x32xbf16>, vector<32x8xbf16>, vector<8x8xf32> -> vector<8x8xf32>
        %125 = arith.truncf %124 : vector<8x8xf32> to vector<8x8xbf16>
        %126 = arith.index_cast %arg17 : i32 to index
        %c0_59 = arith.constant 0 : index
        %c0_60 = arith.constant 0 : index
        %127 = vector.load %arg16[%126, %c0_59, %c0_60] : memref<4x8x8xbf16, #tpu.memory_space<vmem>>, vector<1x8x8xbf16>
        %128 = vector.shape_cast %127 : vector<1x8x8xbf16> to vector<8x8xbf16>
        %129 = vector.shape_cast %125 : vector<8x8xbf16> to vector<1x8x8xbf16>
        tpu.vector_store %arg16[%126, %c0_59, %c0_60], %129 {strides = array<i32>} : memref<4x8x8xbf16, #tpu.memory_space<vmem>>, vector<1x8x8xbf16>,
      }
      %c4_i32_50 = arith.constant 4 : i32
    } else {
    }
    %c8_i32 = arith.constant 8 : i32
    %5 = arith.muli %arg1, %c8_i32 : i32
    %6 = tpu.assume_multiple %5, 8 : i32
    %c0_4 = arith.constant 0 : index
    %7 = arith.index_cast %6 : i32 to index
    %c0_5 = arith.constant 0 : index
    %8 = vector.load %arg2[%c0_4, %7, %c0_5] : memref<1x8x32xbf16, #tpu.memory_space<vmem>>, vector<1x8x32xbf16>
    %9 = vector.shape_cast %8 : vector<1x8x32xbf16> to vector<8x32xbf16>
    %10 = arith.extf %9 : vector<8x32xbf16> to vector<8x32xf32>
    %cst = arith.constant dense<0.000000e+00> : vector<8xf32>
    %11 = vector.multi_reduction <add>, %10, %cst [1] : vector<8x32xf32> to vector<8xf32>
    %12 = vector.shape_cast %11 : vector<8xf32> to vector<8x1xf32>
    %cst_6 = arith.constant 3.200000e+01 : f32
    %13 = vector.broadcast %cst_6 : f32 to vector<8x1xf32>
    %14 = arith.divf %12, %13 : vector<8x1xf32>
    %15 = vector.broadcast %14 : vector<8x1xf32> to vector<8x32xf32>
    %16 = arith.subf %10, %15 : vector<8x32xf32>
    %17 = arith.mulf %16, %16 : vector<8x32xf32>
    %cst_7 = arith.constant dense<0.000000e+00> : vector<8xf32>
    %18 = vector.multi_reduction <add>, %17, %cst_7 [1] : vector<8x32xf32> to vector<8xf32>
    %19 = vector.shape_cast %18 : vector<8xf32> to vector<8x1xf32>
    %cst_8 = arith.constant 0.0322580636 : f32
    %20 = vector.broadcast %cst_8 : f32 to vector<8x1xf32>
    %21 = arith.mulf %19, %20 : vector<8x1xf32>
    %22 = vector.broadcast %14 : vector<8x1xf32> to vector<8x32xf32>
    %23 = arith.subf %10, %22 : vector<8x32xf32>
    %24 = math.sqrt %21 : vector<8x1xf32>
    %cst_9 = arith.constant 9.99999997E-7 : f32
    %25 = vector.broadcast %cst_9 : f32 to vector<8x1xf32>
    %26 = arith.addf %24, %25 : vector<8x1xf32>
    %27 = vector.broadcast %26 : vector<8x1xf32> to vector<8x32xf32>
    %28 = arith.divf %23, %27 : vector<8x32xf32>
    %29 = vector.broadcast %0 : vector<1x32xf32> to vector<8x32xf32>
    %30 = arith.mulf %29, %28 : vector<8x32xf32>
    %31 = vector.broadcast %1 : vector<1x32xf32> to vector<8x32xf32>
    %32 = arith.addf %30, %31 : vector<8x32xf32>
    %33 = arith.truncf %32 : vector<8x32xf32> to vector<8x32xbf16>
    %c0_10 = arith.constant 0 : index
    %c0_11 = arith.constant 0 : index
    %c0_12 = arith.constant 0 : index
    %c0_13 = arith.constant 0 : index
    %34 = vector.load %arg3[%c0_10, %c0_11, %c0_12, %c0_13] : memref<1x1x1x8xf32, #tpu.memory_space<vmem>>, vector<1x1x1x8xf32>
    %35 = vector.shape_cast %34 : vector<1x1x1x8xf32> to vector<1x8xf32>
    %cst_14 = arith.constant 0.000000e+00 : f32
    %36 = vector.broadcast %cst_14 : f32 to vector<1x8xf32>
    %37 = arith.cmpf oeq, %35, %36 : vector<1x8xf32>
    %cst_15 = arith.constant -1.000000e+09 : f32
    %cst_16 = arith.constant 0.000000e+00 : f32
    %38 = vector.broadcast %cst_15 : f32 to vector<1x8xf32>
    %39 = vector.broadcast %cst_16 : f32 to vector<1x8xf32>
    %40 = arith.select %37, %38, %39 : vector<1x8xi1>, vector<1x8xf32>
    %cst_17 = arith.constant 0.000000e+00 : f32
    %41 = vector.broadcast %cst_17 : f32 to vector<8x32xf32>
    %c0_i32_18 = arith.constant 0 : i32
    %c4_i32 = arith.constant 4 : i32
    %42 = arith.addi %c0_i32_18, %c4_i32 : i32
    %c1_i32 = arith.constant 1 : i32
    %43 = scf.for %arg17 = %c0_i32_18 to %42 step %c1_i32 iter_args(%arg18 = %41) -> (vector<8x32xf32>)  : i32 {
      %85 = arith.index_cast %arg17 : i32 to index
      %c0_39 = arith.constant 0 : index
      %c0_40 = arith.constant 0 : index
      %86 = vector.load %arg6[%85, %c0_39, %c0_40] : memref<4x32x8xbf16, #tpu.memory_space<vmem>>, vector<1x32x8xbf16>
      %87 = vector.shape_cast %86 : vector<1x32x8xbf16> to vector<32x8xbf16>
      %cst_41 = arith.constant dense<0.000000e+00> : vector<8x8xf32>
      %88 = tpu.matmul %33, %87, %cst_41 {dimension_numbers = #tpu.dot_dimension_numbers<[1], [0], [0], [1], [0, 0, 1, 1], [], []>} : vector<8x32xbf16>, vector<32x8xbf16>, vector<8x8xf32> -> vector<8x8xf32>
      %89 = arith.truncf %88 : vector<8x8xf32> to vector<8x8xbf16>
      %90 = arith.index_cast %arg17 : i32 to index
      %c0_42 = arith.constant 0 : index
      %c0_43 = arith.constant 0 : index
      %91 = vector.load %arg15[%90, %c0_42, %c0_43] : memref<4x8x8xbf16, #tpu.memory_space<vmem>>, vector<1x8x8xbf16>
      %92 = vector.shape_cast %91 : vector<1x8x8xbf16> to vector<8x8xbf16>
      %cst_44 = arith.constant dense<0.000000e+00> : vector<8x8xf32>
      %93 = tpu.matmul %89, %92, %cst_44 {dimension_numbers = #tpu.dot_dimension_numbers<[1], [1], [0], [0], [0, 0, 1, 0], [], []>} : vector<8x8xbf16>, vector<8x8xbf16>, vector<8x8xf32> -> vector<8x8xf32>
      %94 = vector.broadcast %40 : vector<1x8xf32> to vector<8x8xf32>
      %95 = arith.addf %93, %94 : vector<8x8xf32>
      %cst_45 = arith.constant dense<0xFF800000> : vector<8xf32>
      %96 = vector.multi_reduction <maximumf>, %95, %cst_45 [1] : vector<8x8xf32> to vector<8xf32>
      %97 = vector.shape_cast %96 : vector<8xf32> to vector<8x1xf32>
      %98 = vector.broadcast %97 : vector<8x1xf32> to vector<8x8xf32>
      %99 = arith.subf %95, %98 : vector<8x8xf32>
      %100 = math.exp %99 : vector<8x8xf32>
      %cst_46 = arith.constant dense<0.000000e+00> : vector<8xf32>
      %101 = vector.multi_reduction <add>, %100, %cst_46 [1] : vector<8x8xf32> to vector<8xf32>
      %102 = vector.shape_cast %101 : vector<8xf32> to vector<8x1xf32>
      %103 = tpu.reciprocal %102 {approx = true} : vector<8x1xf32> -> vector<8x1xf32>
      %104 = vector.broadcast %103 : vector<8x1xf32> to vector<8x8xf32>
      %105 = arith.mulf %100, %104 : vector<8x8xf32>
      %106 = arith.truncf %105 : vector<8x8xf32> to vector<8x8xbf16>
      %107 = arith.index_cast %arg17 : i32 to index
      %c0_47 = arith.constant 0 : index
      %c0_48 = arith.constant 0 : index
      %108 = vector.load %arg16[%107, %c0_47, %c0_48] : memref<4x8x8xbf16, #tpu.memory_space<vmem>>, vector<1x8x8xbf16>
      %109 = vector.shape_cast %108 : vector<1x8x8xbf16> to vector<8x8xbf16>
      %cst_49 = arith.constant dense<0.000000e+00> : vector<8x8xf32>
      %110 = tpu.matmul %106, %109, %cst_49 {dimension_numbers = #tpu.dot_dimension_numbers<[1], [0], [0], [1], [0, 0, 1, 1], [], []>} : vector<8x8xbf16>, vector<8x8xbf16>, vector<8x8xf32> -> vector<8x8xf32>
      %111 = arith.truncf %110 : vector<8x8xf32> to vector<8x8xbf16>
      %112 = arith.index_cast %arg17 : i32 to index
      %c0_50 = arith.constant 0 : index
      %c0_51 = arith.constant 0 : index
      %113 = vector.load %arg9[%112, %c0_50, %c0_51] : memref<4x8x32xbf16, #tpu.memory_space<vmem>>, vector<1x8x32xbf16>
      %114 = vector.shape_cast %113 : vector<1x8x32xbf16> to vector<8x32xbf16>
      %cst_52 = arith.constant dense<0.000000e+00> : vector<8x32xf32>
      %115 = tpu.matmul %111, %114, %cst_52 {dimension_numbers = #tpu.dot_dimension_numbers<[1], [0], [0], [1], [0, 0, 1, 1], [], []>} : vector<8x8xbf16>, vector<8x32xbf16>, vector<8x32xf32> -> vector<8x32xf32>
      %116 = arith.addf %arg18, %115 : vector<8x32xf32>
      scf.yield %116 : vector<8x32xf32>
    }
    %c4_i32_19 = arith.constant 4 : i32
    %44 = arith.addf %10, %43 : vector<8x32xf32>
    %cst_20 = arith.constant dense<0.000000e+00> : vector<8xf32>
    %45 = vector.multi_reduction <add>, %44, %cst_20 [1] : vector<8x32xf32> to vector<8xf32>
    %46 = vector.shape_cast %45 : vector<8xf32> to vector<8x1xf32>
    %cst_21 = arith.constant 3.200000e+01 : f32
    %47 = vector.broadcast %cst_21 : f32 to vector<8x1xf32>
    %48 = arith.divf %46, %47 : vector<8x1xf32>
    %49 = vector.broadcast %48 : vector<8x1xf32> to vector<8x32xf32>
    %50 = arith.subf %44, %49 : vector<8x32xf32>
    %51 = arith.mulf %50, %50 : vector<8x32xf32>
    %cst_22 = arith.constant dense<0.000000e+00> : vector<8xf32>
    %52 = vector.multi_reduction <add>, %51, %cst_22 [1] : vector<8x32xf32> to vector<8xf32>
    %53 = vector.shape_cast %52 : vector<8xf32> to vector<8x1xf32>
    %cst_23 = arith.constant 0.0322580636 : f32
    %54 = vector.broadcast %cst_23 : f32 to vector<8x1xf32>
    %55 = arith.mulf %53, %54 : vector<8x1xf32>
    %56 = vector.broadcast %48 : vector<8x1xf32> to vector<8x32xf32>
    %57 = arith.subf %44, %56 : vector<8x32xf32>
    %58 = math.sqrt %55 : vector<8x1xf32>
    %cst_24 = arith.constant 9.99999997E-7 : f32
    %59 = vector.broadcast %cst_24 : f32 to vector<8x1xf32>
    %60 = arith.addf %58, %59 : vector<8x1xf32>
    %61 = vector.broadcast %60 : vector<8x1xf32> to vector<8x32xf32>
    %62 = arith.divf %57, %61 : vector<8x32xf32>
    %63 = vector.broadcast %0 : vector<1x32xf32> to vector<8x32xf32>
    %64 = arith.mulf %63, %62 : vector<8x32xf32>
    %65 = vector.broadcast %1 : vector<1x32xf32> to vector<8x32xf32>
    %66 = arith.addf %64, %65 : vector<8x32xf32>
    %67 = arith.truncf %66 : vector<8x32xf32> to vector<8x32xbf16>
    %c0_25 = arith.constant 0 : index
    %c0_26 = arith.constant 0 : index
    %68 = vector.load %arg10[%c0_25, %c0_26] : memref<32x64xbf16, #tpu.memory_space<vmem>>, vector<32x64xbf16>
    %cst_27 = arith.constant dense<0.000000e+00> : vector<8x64xf32>
    %69 = tpu.matmul %67, %68, %cst_27 {dimension_numbers = #tpu.dot_dimension_numbers<[1], [0], [0], [1], [0, 0, 1, 1], [], []>} : vector<8x32xbf16>, vector<32x64xbf16>, vector<8x64xf32> -> vector<8x64xf32>
    %c0_28 = arith.constant 0 : index
    %c0_29 = arith.constant 0 : index
    %70 = vector.load %arg11[%c0_28, %c0_29] : memref<1x64xf32, #tpu.memory_space<vmem>>, vector<1x64xf32>
    %71 = vector.broadcast %70 : vector<1x64xf32> to vector<8x64xf32>
    %72 = arith.addf %69, %71 : vector<8x64xf32>
    %cst_30 = arith.constant 0.000000e+00 : f32
    %73 = vector.broadcast %cst_30 : f32 to vector<8x64xf32>
    %74 = arith.maximumf %72, %73 : vector<8x64xf32>
    %75 = arith.truncf %74 : vector<8x64xf32> to vector<8x64xbf16>
    %c0_31 = arith.constant 0 : index
    %c0_32 = arith.constant 0 : index
    %76 = vector.load %arg12[%c0_31, %c0_32] : memref<64x32xbf16, #tpu.memory_space<vmem>>, vector<64x32xbf16>
    %cst_33 = arith.constant dense<0.000000e+00> : vector<8x32xf32>
    %77 = tpu.matmul %75, %76, %cst_33 {dimension_numbers = #tpu.dot_dimension_numbers<[1], [0], [0], [1], [0, 0, 1, 1], [], []>} : vector<8x64xbf16>, vector<64x32xbf16>, vector<8x32xf32> -> vector<8x32xf32>
    %c0_34 = arith.constant 0 : index
    %c0_35 = arith.constant 0 : index
    %78 = vector.load %arg13[%c0_34, %c0_35] : memref<1x32xf32, #tpu.memory_space<vmem>>, vector<1x32xf32>
    %79 = vector.broadcast %78 : vector<1x32xf32> to vector<8x32xf32>
    %80 = arith.addf %77, %79 : vector<8x32xf32>
    %81 = arith.addf %44, %80 : vector<8x32xf32>
    %c0_36 = arith.constant 0 : index
    %c0_37 = arith.constant 0 : index
    %c0_38 = arith.constant 0 : index
    %82 = vector.load %arg14[%c0_36, %c0_37, %c0_38] : memref<1x8x32xf32, #tpu.memory_space<vmem>>, vector<1x8x32xf32>
    %83 = vector.shape_cast %82 : vector<1x8x32xf32> to vector<8x32xf32>
    %84 = vector.shape_cast %81 : vector<8x32xf32> to vector<1x8x32xf32>
    tpu.vector_store %arg14[%c0_36, %c0_37, %c0_38], %84 {strides = array<i32>} : memref<1x8x32xf32, #tpu.memory_space<vmem>>, vector<1x8x32xf32>,
    return
  }
  func.func @transform_0(%arg0: i32, %arg1: i32) -> (i32, i32, i32) {
    %c0_i32 = arith.constant 0 : i32
    %c0_i32_0 = arith.constant 0 : i32
    %c0_i32_1 = arith.constant 0 : i32
    return %arg0, %c0_i32, %c0_i32_0 : i32, i32, i32
  }
  func.func @transform_1(%arg0: i32, %arg1: i32) -> (i32, i32, i32, i32) {
    %c0_i32 = arith.constant 0 : i32
    %c0_i32_0 = arith.constant 0 : i32
    %c0_i32_1 = arith.constant 0 : i32
    %c0_i32_2 = arith.constant 0 : i32
    return %arg0, %c0_i32, %c0_i32_0, %c0_i32_1 : i32, i32, i32, i32
  }
  func.func @transform_2(%arg0: i32, %arg1: i32) -> (i32, i32) {
    %c0_i32 = arith.constant 0 : i32
    %c0_i32_0 = arith.constant 0 : i32
    %c0_i32_1 = arith.constant 0 : i32
    return %c0_i32, %c0_i32_0 : i32, i32
  }
  func.func @transform_3(%arg0: i32, %arg1: i32) -> (i32, i32) {
    %c0_i32 = arith.constant 0 : i32
    %c0_i32_0 = arith.constant 0 : i32
    %c0_i32_1 = arith.constant 0 : i32
    return %c0_i32, %c0_i32_0 : i32, i32
  }
  func.func @transform_4(%arg0: i32, %arg1: i32) -> (i32, i32, i32) {
    %c0_i32 = arith.constant 0 : i32
    %c0_i32_0 = arith.constant 0 : i32
    %c0_i32_1 = arith.constant 0 : i32
    %c0_i32_2 = arith.constant 0 : i32
    return %c0_i32, %c0_i32_0, %c0_i32_1 : i32, i32, i32
  }
  func.func @transform_5(%arg0: i32, %arg1: i32) -> (i32, i32, i32) {
    %c0_i32 = arith.constant 0 : i32
    %c0_i32_0 = arith.constant 0 : i32
    %c0_i32_1 = arith.constant 0 : i32
    %c0_i32_2 = arith.constant 0 : i32
    return %c0_i32, %c0_i32_0, %c0_i32_1 : i32, i32, i32
  }
  func.func @transform_6(%arg0: i32, %arg1: i32) -> (i32, i32, i32) {
    %c0_i32 = arith.constant 0 : i32
    %c0_i32_0 = arith.constant 0 : i32
    %c0_i32_1 = arith.constant 0 : i32
    %c0_i32_2 = arith.constant 0 : i32
    return %c0_i32, %c0_i32_0, %c0_i32_1 : i32, i32, i32
  }
  func.func @transform_7(%arg0: i32, %arg1: i32) -> (i32, i32, i32) {
    %c0_i32 = arith.constant 0 : i32
    %c0_i32_0 = arith.constant 0 : i32
    %c0_i32_1 = arith.constant 0 : i32
    %c0_i32_2 = arith.constant 0 : i32
    return %c0_i32, %c0_i32_0, %c0_i32_1 : i32, i32, i32
  }
  func.func @transform_8(%arg0: i32, %arg1: i32) -> (i32, i32) {
    %c0_i32 = arith.constant 0 : i32
    %c0_i32_0 = arith.constant 0 : i32
    %c0_i32_1 = arith.constant 0 : i32
    return %c0_i32, %c0_i32_0 : i32, i32
  }
  func.func @transform_9(%arg0: i32, %arg1: i32) -> (i32, i32) {
    %c0_i32 = arith.constant 0 : i32
    %c0_i32_0 = arith.constant 0 : i32
    %c0_i32_1 = arith.constant 0 : i32
    return %c0_i32, %c0_i32_0 : i32, i32
  }
  func.func @transform_10(%arg0: i32, %arg1: i32) -> (i32, i32) {
    %c0_i32 = arith.constant 0 : i32
    %c0_i32_0 = arith.constant 0 : i32
    %c0_i32_1 = arith.constant 0 : i32
    return %c0_i32, %c0_i32_0 : i32, i32
  }
  func.func @transform_11(%arg0: i32, %arg1: i32) -> (i32, i32) {
    %c0_i32 = arith.constant 0 : i32
    %c0_i32_0 = arith.constant 0 : i32
    %c0_i32_1 = arith.constant 0 : i32
    return %c0_i32, %c0_i32_0 : i32, i32
  }
  func.func @transform_12(%arg0: i32, %arg1: i32) -> (i32, i32, i32) {
    %c0_i32 = arith.constant 0 : i32
    %c0_i32_0 = arith.constant 0 : i32
    return %arg0, %arg1, %c0_i32 : i32, i32, i32
  }
}

</mosaic_0001>

<bundles_post_ra>
// kernel: tpu_custom_call.1
= control target key start
LH: loop header
LB: loop body
LE: loop exit
PB: predicated region body
PF: predicated region fallthrough
CT: control target
= control target key end

     0   :  { %s1902_s0 = inlined_call_operand.vmem [shape: bf16[2,8,32], index: 0, kind: input, shape index: {}]   ;;  %s1903_s1 = inlined_call_operand.vmem [shape: f32[2,1,1,8], index: 1, kind: input, shape index: {}]   ;;  %s1904_s2 = inlined_call_operand.vmem [shape: f32[1,32], index: 2, kind: input, shape index: {}]   ;;  %s1905_s3 = inlined_call_operand.vmem [shape: f32[1,32], index: 3, kind: input, shape index: {}]   ;;  %s1906_s4 = inlined_call_operand.vmem [shape: bf16[4,32,8], index: 4, kind: input, shape index: {}]   ;;  %s1907_s5 = inlined_call_operand.vmem [shape: bf16[4,32,8], index: 5, kind: input, shape index: {}]   ;;  %s1908_s6 = inlined_call_operand.vmem [shape: bf16[4,32,8], index: 6, kind: input, shape index: {}]   ;;  %s1909_s7 = inlined_call_operand.vmem [shape: bf16[4,8,32], index: 7, kind: input, shape index: {}]   ;;  %s1910_s8 = inlined_call_operand.vmem [shape: bf16[32,64], index: 8, kind: input, shape index: {}]   ;;  %s1911_s9 = inlined_call_operand.vmem [shape: f32[1,64], index: 9, kind: input, shape index: {}]   ;;  %s1912_s10 = inlined_call_operand.vmem [shape: bf16[64,32], index: 10, kind: input, shape index: {}]   ;;  %s1913_s11 = inlined_call_operand.vmem [shape: f32[1,32], index: 11, kind: input, shape index: {}]   ;;  %s1914_s12 = inlined_call_operand.hbm [shape: f32[2,8,32], index: 12, kind: output, shape index: {}]  }
   0x1   :  { %1916 = sst [smem:[#allocation7_spill]] %s1902_s0 }
   0x2   :  { %1917 = sst [smem:[#allocation8_spill]] %s1904_s2 }
   0x3   :  { %1918 = sst [smem:[#allocation9_spill]] %s1905_s3 }
   0x4   :  { %17 = vsyncpa [#allocation5], 0 }
   0x5   :  { %19 = vsyncpa [#allocation5 + $0x1], 0  ;;  %s1624_s21 = smov 0   ;;  %s1626_s22 = smov 0  }
   0x6   :  { %s1628_s23 = smov 0   ;;  %s1630_s24 = smov 0  }
   0x7   :  { %s1632_s25 = smov 0   ;;  %s1634_s26 = smov 0  }
   0x8 LB: > { %s1204_s27 = sadd.s32 4294967295, %s1538_s26   ;;  %s1205_s28 = sadd.s32 4294967294, %s1538_s26   ;;  %s1538_s26 = sphi %s1634_s26, %s25_s26   ;;  %s1534_s25 = sphi %s1632_s25, %s1933_s25   ;;  %s1530_s24 = sphi %s1630_s24, %s1932_s24   ;;  %s1526_s23 = sphi %s1628_s23, %s1931_s23   ;;  %s1522_s22 = sphi %s1626_s22, %s1930_s22   ;;  %s1518_s21 = sphi %s1624_s21, %s1929_s21  }
   0x9   : > { %s37_s29 = sadd.s32 1, %s1534_s25  ;;  %s308_s30 = sadd.s32 1, %s1526_s23 }
   0xa   : > { %p39_p0 = scmp.ge.s32.totalorder %s37_s29, 2  ;;  %p318_p1 = scmp.ne.s32.totalorder %s1526_s23, %s1522_s22 }
   0xb   : > { %p319_p2 = scmp.eq.s32.totalorder %s1204_s27, 1  ;;  %p324_p3 = scmp.ne.s32.totalorder %s1522_s22, %s1518_s21 }
   0xc   : > { %s1935_s29 = smov (%p39_p0, %s37_s29), 0  ;;  %p325_p5 = scmp.eq.s32.totalorder %s1205_s28, 1 }
   0xd   : > { %p1664_p4 = por %p319_p2, %p318_p1  ;;  %s303_s14 = ssub.s32 %s1534_s25, %s1935_s29 }
   0xe   : > { %p1208_p6 = scmp.ge.s32.totalorder %s1538_s26, 1  ;;  %p306_p7 = scmp.eq.s32.totalorder %s303_s14, 0 }
   0xf   : > { %p1671_p8 = por %p325_p5, %p324_p3  ;;  %p386_p9 = scmp.lt.s32.totalorder %s1538_s26, 3 }
  0x10   : > { %s1677_s16 = scalar_select %p306_p7, %s1526_s23, %s308_s30  }
  0x11   : > { %p387_p10 = pnand %p1208_p6, %p386_p9 }
  0x12   : > { %p430_p11 = scmp.lt.s32.totalorder (!%p387_p10), %s1530_s24, 1  ;;  %s1921_s0 = sld [smem:[#allocation7_spill]] (!%p387_p10) }
  0x13   : > { %390 = sbr.rel (%p387_p10) target bundleno = 2537 (0x9e9), region = 68  ;;  %s1915_s19 = sand.u32 (!%p387_p10), 1, %s1522_s22  }
  0x14   : > { %s1922_s2 = sld [smem:[#allocation8_spill]] (!%p387_p10) }
  0x15   : > { %s1923_s3 = sld [smem:[#allocation9_spill]] (!%p387_p10) }
  0x18   : > { %s1681_s17 = scalar_select %p430_p11, %s1530_s24, 1  ;;  %vm446_vm0 = vcmask 261120   ;;  %v469_v8 = vlaneseq }
  0x1a   : > { %s1210_s18 = sshll.u32 %s1681_s17, 2  ;;  %v1697_v9 = vshrl.u32 %v469_v8, 7  ;;  %v1707_v20 = vld [vmem:[%s1922_s2] ss:$0 sm:$0xff] }
  0x1b   : > { %s1691_s30 = scalar_lea.vmem %s1921_s0, %s1210_s18  ;;  %s1701_s18 = sshll.u32 %s1915_s19, 3  ;;  %v1712_v22 = vld [vmem:[%s1923_s3] ss:$0 sm:$0xff] }
  0x1c   : > { %v444_v0 = vld [vmem:[%s1691_s30] sm:$0xf]  ;;  %v471_v10 = vsub.s32 0, %v1697_v9  ;;  %s1717_s0 = smov 0  }
  0x1d   : > { %v445_v1 = vunpack.c.l.bf16 %v444_v0 }
  0x1f   : > { %v447_v2 = vsel %vm446_vm0, %v445_v1, 0.0 }
  0x20   : > { %448 = vadd.xlane.f32.xlu0 %v447_v2 }
  0xa9   : > { %v449_v3 = vpop.xlane.xlu0 %448 }
  0xaa   : > { %v451_v4 = vmul.f32 0.03125, %v449_v3 }
  0xac   : > { %v452_v5 = vsub.f32 %v445_v1, %v451_v4 }
  0xae   : > { %v453_v6 = vmul.f32 %v452_v5, %v452_v5 }
  0xb0   : > { %v454_v7 = vsel %vm446_vm0, %v453_v6, 0.0 }
  0xb1   : > { %455 = vadd.xlane.f32.xlu0 %v454_v7 }
 0x13a   : > { %v456_v11 = vpop.xlane.xlu0 %455 }
 0x13b   : > { %v457_v12 = vmul.f32 0.032258064, %v456_v11 }
 0x13d   : > { %1422 = vrsqrt.f32 %v457_v12  ;;  %vm460_vm1 = vcmp.eq.f32.partialorder %v457_v12, inf  ;;  %v463_v15 = vand.u32 2147483648, %v457_v12  ;;  %vm462_vm2 = vcmp.eq.f32.partialorder %v457_v12, 0.0 }
 0x14a   : > { %v1423_v13 = vpop.eup %1422 }
 0x14b   : > { %v459_v14 = vmul.f32 %v1423_v13, %v457_v12 }
 0x14d   : > { %v461_v16 = vsel %vm460_vm1, %v457_v12, %v459_v14 }
 0x14e   : > { %v464_v17 = vsel %vm462_vm2, %v463_v15, %v461_v16 }
 0x14f   : > { %v465_v18 = vadd.f32 1e-06, %v464_v17 }
 0x151   : > { %1424 = vrcp.f32 %v465_v18 }
 0x15e   : > { %v1425_v19 = vpop.eup %1424 }
 0x15f   : > { %v467_v21 = vmul.f32 %v1425_v19, %v452_v5 }
 0x161   : > { %v474_v23 = vmul.f32 %v1707_v20, %v467_v21 }
 0x163   : > { %v481_v24 = vadd.f32 %v1712_v22, %v474_v23 }
 0x165   : > { %v482_v25 = vpack.c.bf16 %v481_v24, %v481_v24 }
 0x166 LB: >> { %v1552_v26 = vmov 0.0   ;;  %s1247_s19 = sshll.u32 %s1542_s0, 4  ;;  %vm1553_vm3 = vmmov 0   ;;  %s1216_s20 = sshll.u32 %s1542_s0, 2  ;;  %vm554_vm4 = vcmask 60416   ;;  %s1542_s0 = sphi %s1717_s0, %s488_s0  }
 0x167   : >> { %1275 = vmatprep.subr.bf16.mxu0 %v1552_v26  ;;  %1283 = vmatprep.subr.bf16.mxu1 %v1552_v26  ;;  %s491_s14 = scalar_lea.vmem %s1907_s5, %s1247_s19  ;;  %s557_s3 = scalar_lea.vmem %s1908_s6, %s1247_s19 }
 0x168   : >> { %1279 = vmatprep.mubr.msk.bf16.mxu0 %vm1553_vm3, %v1552_v26  ;;  %1287 = vmatprep.mubr.msk.bf16.mxu1 %vm1553_vm3, %v1552_v26  ;;  %v1426_v27 = vld [vmem:[%s491_s14 + $0x8] sm:$0xff]   ;;  %v1428_v29 = vld [vmem:[%s491_s14] sm:$0xff]   ;;  %s553_s2 = scalar_lea.vmem [#allocation2], %s1216_s20  ;;  %s616_s27 = scalar_lea.vmem [#allocation3], %s1216_s20 }
 0x169   : >> { %v1427_v28 = vld [vmem:[%s557_s3 + $0x8] sm:$0xff]   ;;  %1276 = vmatpush3.bf16.msra.mxu0 %v1426_v27  ;;  %v1429_v30 = vld [vmem:[%s557_s3] sm:$0xff]   ;;  %s488_s0 = sadd.s32 1, %s1542_s0  }
 0x16a   : >> { %1284 = vmatpush3.bf16.msra.mxu1 %v1427_v28  ;;  %1277 = vmatprep.subr.bf16.mxu0 %v1552_v26  ;;  %p485_p12 = scmp.ge.s32.totalorder %s488_s0, 4  }
 0x16b   : >> { %1285 = vmatprep.subr.bf16.mxu1 %v1552_v26  ;;  %v623_v41 = vld [vmem:[%s1691_s30] sm:$0xf] (%p485_p12)  ;;  %s1924_s19 = scalar_lea.vmem (%p485_p12), %s1903_s1, %s1681_s17  ;;  %v1554_v50 = vmov (%p485_p12), 0.0   ;;  %v1756_v1 = vmov (%p485_p12), 0.0   ;;  %s1758_s17 = smov (%p485_p12), 0  }
 0x16c   : > { %v1736_v42 = vunpack.c.l.bf16 (%p485_p12), %v623_v41  ;;  %v662_v49 = vld [vmem:[%s1924_s19] sm:$0x1] (%p485_p12) }
 0x16d   : >> { %1278 = vmatpush3.bf16.msra.mxu0 %v1428_v29  ;;  %vm663_vm5 = vcmp.eq.f32.partialorder (%p485_p12), %v662_v49, 0.0 }
 0x16e   : >> { %1286 = vmatpush3.bf16.msra.mxu1 %v1429_v30  ;;  %v626_v43 = vsel (%p485_p12), %vm446_vm0, %v1736_v42, 0.0  ;;  %v1748_v51 = vsel (%p485_p12), %vm663_vm5, -1e+09, %v1554_v50 }
 0x16f   : > { %627 = vadd.xlane.f32.xlu0 (%p485_p12), %v626_v43 }
 0x170   : >> { %1280 = vmatmul.mubr.msk.bf16.vlgmr.msra.gmra.mxu0 %vm446_vm0, %v482_v25 }
 0x171   : >> { %1288 = vmatmul.mubr.msk.bf16.vlgmr.msra.gmra.mxu1 %vm446_vm0, %v482_v25 }
 0x1f8   : > { %v628_v44 = vpop.xlane.xlu0 (%p485_p12), %627 }
 0x1f9   : > { %v630_v45 = vmul.f32 (%p485_p12), 0.03125, %v628_v44 }
 0x1fb   : > { %v631_v46 = vsub.f32 (%p485_p12), %v1736_v42, %v630_v45 }
 0x1fd   : > { %v632_v47 = vmul.f32 (%p485_p12), %v631_v46, %v631_v46 }
 0x1ff   : > { %v633_v48 = vsel (%p485_p12), %vm446_vm0, %v632_v47, 0.0 }
 0x200   : > { %634 = vadd.xlane.f32.xlu0 (%p485_p12), %v633_v48 }
 0x230   : >> { %v545_v31 = vpop.f32.mrf.mxu0 }
 0x231   : >> { %v551_v32 = vpack.c.bf16 %v545_v31, %v545_v31  ;;  %v608_v33 = vpop.f32.mrf.mxu1 }
 0x232   : >> { %v614_v34 = vpack.c.bf16 %v608_v33, %v608_v33  ;;  %v1281_v35 = vpop.f32.mrf.mxu0 }
 0x233   : >> { %555 = vst.msk [vmem:[%s553_s2] sm:$0xf] %vm554_vm4, %v551_v32  ;;  %v1289_v36 = vpop.f32.mrf.mxu1  ;;  %487 = sbr.rel (!%p485_p12) target bundleno = 358 (0x166), region = 133 }
 0x234   : >> { %617 = vst.msk [vmem:[%s616_s27] sm:$0xf] %vm554_vm4, %v614_v34  ;;  %v548_v37 = vpop.f32.mrf.mxu0 }
 0x235   : >> { %v611_v38 = vpop.f32.mrf.mxu1 }
 0x236   : >> { %v1282_v39 = vpop.f32.mrf.mxu0 }
 0x237   : >> { %v1290_v40 = vpop.f32.mrf.mxu1 }
 0x289   : > { %v635_v52 = vpop.xlane.xlu0 %634 }
 0x28a   : > { %v636_v53 = vmul.f32 0.032258064, %v635_v52 }
 0x28c   : > { %1430 = vrsqrt.f32 %v636_v53  ;;  %vm639_vm6 = vcmp.eq.f32.partialorder %v636_v53, inf  ;;  %v642_v56 = vand.u32 2147483648, %v636_v53  ;;  %vm641_vm7 = vcmp.eq.f32.partialorder %v636_v53, 0.0 }
 0x299   : > { %v1431_v54 = vpop.eup %1430 }
 0x29a   : > { %v638_v55 = vmul.f32 %v1431_v54, %v636_v53 }
 0x29c   : > { %v640_v57 = vsel %vm639_vm6, %v636_v53, %v638_v55 }
 0x29d   : > { %v643_v58 = vsel %vm641_vm7, %v642_v56, %v640_v57 }
 0x29e   : > { %v644_v59 = vadd.f32 1e-06, %v643_v58 }
 0x2a0   : > { %1432 = vrcp.f32 %v644_v59 }
 0x2ad   : > { %v1433_v60 = vpop.eup %1432 }
 0x2ae   : > { %v646_v61 = vmul.f32 %v1433_v60, %v631_v46 }
 0x2b0   : > { %v653_v62 = vmul.f32 %v1707_v20, %v646_v61 }
 0x2b2   : > { %v1752_v63 = vadd.f32 %v1712_v22, %v653_v62 }
 0x2b4   : > { %v661_v0 = vpack.c.bf16 %v1752_v63, %v1752_v63 }
 0x2b5 LB: >> { %v1555_v2 = vmov 0.0   ;;  %vm1556_vm8 = vmmov 0   ;;  %s1249_s30 = sshll.u32 %s1550_s17, 4  ;;  %s1769_s28 = sshll.u32 %s1550_s17, 2  ;;  %vm744_vm9 = vcmask 64512   ;;  %v742_v14 = vrot.slane %v1748_v51, %v471_v10  ;;  %s1550_s17 = sphi %s1758_s17, %s670_s17   ;;  %v1546_v1 = vphi %v1756_v1, %v1925_v1  }
 0x2b6   : >> { %1291 = vmatprep.subr.bf16.mxu0 %v1555_v2  ;;  %1295 = vmatprep.mubr.msk.bf16.mxu0 %vm1556_vm8, %v1555_v2  ;;  %s674_s2 = scalar_lea.vmem %s1906_s4, %s1249_s30  ;;  %s736_s27 = scalar_lea.vmem [#allocation2], %s1769_s28  ;;  %vm809_vm10 = vcmask 1043456  }
 0x2b7   : >> { %1299 = vmatprep.subr.bf16.mxu1 %v1555_v2  ;;  %1301 = vmatprep.mubr.msk.bf16.mxu1 %vm1556_vm8, %v1555_v2  ;;  %v1434_v3 = vld [vmem:[%s674_s2 + $0x8] sm:$0xff]   ;;  %v1435_v4 = vld [vmem:[%s674_s2] sm:$0xff]   ;;  %s804_s3 = scalar_lea.vmem [#allocation3], %s1769_s28  ;;  %s855_s30 = scalar_lea.vmem %s1909_s7, %s1769_s28 }
 0x2b8   : >> { %1292 = vmatpush3.bf16.msra.mxu0 %v1434_v3  ;;  %v737_v5 = vld [vmem:[%s736_s27] sm:$0xf]  ;;  %s670_s17 = sadd.s32 1, %s1550_s17  }
 0x2b9   : >> { %1293 = vmatprep.subr.bf16.mxu0 %v1555_v2  ;;  %v749_v6 = vsel %vm744_vm9, %v737_v5, 0  ;;  %v805_v28 = vld [vmem:[%s804_s3] sm:$0xf]  ;;  %p667_p13 = scmp.ge.s32.totalorder %s670_s17, 4  }
 0x2ba   : >> { %1300 = vmatpush3.bf16.xpose.msra.mxu1 %v749_v6  ;;  %v811_v29 = vsel %vm809_vm10, %v805_v28, 0  ;;  %v856_v30 = vld [vmem:[%s855_s30] sm:$0xf]  ;;  %v1440_v9 = vld [vmem:[%s1910_s8 + $0x8] sm:$0xff] (%p667_p13)   ;;  %vm1557_vm11 = vmmov (%p667_p13), 0   ;;  %v1443_v51 = vld [vmem:[%s1912_s10 + $0x10] sm:$0xff] (%p667_p13)  }
 0x2bb   : >> { %1311 = vmatprep.subr.bf16.mxu1 %v1555_v2  ;;  %v861_v31 = vsel %vm809_vm10, %v856_v30, 0  ;;  %v1441_v10 = vld [vmem:[%s1910_s8] sm:$0xff] (%p667_p13)   ;;  %v1444_v5 = vld [vmem:[%s1912_s10 + $0x8] sm:$0xff] (%p667_p13)   ;;  %vm1035_vm14 = vcmask (%p667_p13), 523264   ;;  %s1244_s3 = sshll.u32 (%p667_p13), %s1530_s24, 7  ;;  %s1926_s0 = scalar_lea.vmem (%p667_p13), [#allocation4], %s1701_s18 }
 0x2bc   : >> { %1294 = vmatpush3.bf16.msra.mxu0 %v1435_v4  ;;  %v1445_v6 = vld [vmem:[%s1912_s10] sm:$0xff] (%p667_p13)   ;;  %s1096_s19 = sshll.u32 (%p667_p13), %s1926_s0, 4  ;;  %s1851_s28 = scalar_lea.hbm (%p667_p13), %s1914_s12, %s1244_s3  ;;  %s1853_s19 = int_to_ptr.vmem [resolvable:$true] %s1096_s19 }
 0x2bd   : >> { %1305 = vmatprep.subr.bf16.mxu0 %v1555_v2  ;;  %s1927_s14 = smov (%p667_p13), %s1926_s0  ;;  %s1928_s24 = sand.u32 (%p667_p13), 1, %s1522_s22  }
 0x2be   : > { %s1082_s20 = scalar_lea.sflag (%p667_p13), [#allocation5], %s1928_s24  ;;  %s1450_s2 = scalar_lea.vmem (%p667_p13), %s1853_s19, 128 }
 0x2bf   : >> { %1296 = vmatmul.mubr.msk.bf16.vlgmr.msra.gmra.mxu0 %vm446_vm0, %v661_v0  ;;  %p1451_p0 = scmp.ne.s32.totalorder (%p667_p13), %s1853_s19, %s1450_s2  ;;  %s1558_s27 = smov (%p667_p13), [#allocation4]  }
 0x2c0   : >> { %1307 = vmatprep.mubr.msk.bf16.mxu0 %vm1556_vm8, %v1555_v2  ;;  %1306 = vmatpush3.bf16.msra.mxu0 %v811_v29  ;;  %s1454_s3 = sshll.u32 (%p667_p13), %s1558_s27, 4  ;;  %s1455_s3 = int_to_ptr.vmem [resolvable:$false] %s1454_s3 }
 0x2c1   : > { %1317 = vmatprep.subr.bf16.mxu0 (%p667_p13), %v1554_v50  ;;  %p1452_p1 = pnand (%p667_p13), %p1451_p0, %p1664_p4  ;;  %s1456_s0 = scalar_lea.vmem (%p667_p13), %s1455_s3, 256 }
 0x2c2   : > { %p1457_p3 = scmp.lt.s32.totalorder (%p667_p13), %s1853_s19, %s1455_s3  ;;  %p1458_p5 = scmp.lt.s32.totalorder (%p667_p13), %s1456_s0, %s1450_s2 }
 0x2c3   : > { %p1453_p2 = pneg (%p667_p13), %p1452_p1 }
 0x2c4   : > { %p1459_p6 = por (%p667_p13), %p1458_p5, %p1457_p3 }
 0x2c6   : > { %p1460_p7 = pnand (%p667_p13), %p1459_p6, %p1453_p2 }
 0x37f   : >> { %v728_v7 = vpop.f32.mrf.mxu0 }
 0x380   : >> { %v734_v8 = vpack.c.bf16 %v728_v7, %v728_v7 }
 0x381   : >> { %v1297_v11 = vpop.f32.mrf.mxu0 }
 0x382   : >> { %1302 = vmatmul.mubr.msk.bf16.vlgmr.msra.gmra.mxu1 %vm744_vm9, %v734_v8 }
 0x383   : >> { %v731_v12 = vpop.f32.mrf.mxu0  ;;  %1313 = vmatprep.mubr.msk.bf16.mxu1 %vm1556_vm8, %v1555_v2  ;;  %1312 = vmatpush3.bf16.msra.mxu1 %v861_v31 }
 0x384   : > { %1325 = vmatprep.subr.bf16.mxu1 (%p667_p13), %v1554_v50 }
 0x385   : >> { %v1298_v13 = vpop.f32.mrf.mxu0 }
 0x442   : >> { %v785_v15 = vpop.f32.mrf.mxu1 }
 0x443   : >> { %v786_v16 = vadd.f32 %v785_v15, %v742_v14  ;;  %v1237_v14 = vld [vmem:[%s1913_s11] ss:$0 sm:$0xff] (%p667_p13) }
 0x444   : >> { %v1303_v17 = vpop.f32.mrf.mxu1 }
 0x445   : >> { %v791_v18 = vsel %vm744_vm9, %v786_v16, -inf }
 0x446   : >> { %792 = vmax.xlane.f32.xlu0 %v791_v18  ;;  %v788_v19 = vpop.f32.mrf.mxu1 }
 0x448   : >> { %v1304_v21 = vpop.f32.mrf.mxu1 }
 0x4cf   : >> { %v793_v23 = vpop.xlane.xlu0 %792 }
 0x4d0   : >> { %v794_v24 = vsub.f32 %v786_v16, %v793_v23 }
 0x4d2   : >> { %v795_v25 = vmul.f32 1.442695, %v794_v24 }
 0x4d4   : >> { %1436 = vpow2.f32 %v795_v25 }
 0x4e1   : >> { %v1437_v26 = vpop.eup %1436 }
 0x4e2   : >> { %v797_v27 = vsel %vm744_vm9, %v1437_v26, 0.0 }
 0x4e3   : >> { %798 = vadd.xlane.f32.xlu0 %v797_v27 }
 0x56c   : >> { %v799_v32 = vpop.xlane.xlu0 %798 }
 0x56d   : >> { %1438 = vrcp.f32 %v799_v32 }
 0x57a   : >> { %v1439_v33 = vpop.eup %1438 }
 0x57b   : >> { %v801_v34 = vmul.f32 %v1439_v33, %v1437_v26 }
 0x57d   : >> { %v802_v35 = vpack.c.bf16 %v801_v34, %v801_v34 }
 0x57f   : >> { %1308 = vmatmul.mubr.msk.bf16.vlgmr.msra.gmra.mxu0 %vm744_vm9, %v802_v35 }
 0x580   : > { %1321 = vmatprep.mubr.msk.bf16.mxu0 (%p667_p13), %vm1557_vm11, %v1554_v50  ;;  %1318 = vmatpush3.bf16.msra.mxu0 (%p667_p13), %v1440_v9 }
 0x581   : > { %1319 = vmatprep.subr.bf16.mxu0 (%p667_p13), %v1554_v50 }
 0x584   : > { %1320 = vmatpush3.bf16.msra.mxu0 (%p667_p13), %v1441_v10 }
 0x63f   : >> { %v847_v36 = vpop.f32.mrf.mxu0 }
 0x640   : >> { %v853_v37 = vpack.c.bf16 %v847_v36, %v847_v36 }
 0x641   : >> { %v1309_v38 = vpop.f32.mrf.mxu0 }
 0x642   : >> { %1314 = vmatmul.mubr.msk.bf16.vlgmr.msra.gmra.mxu1 %vm744_vm9, %v853_v37 }
 0x643   : >> { %v850_v39 = vpop.f32.mrf.mxu0  ;;  %1333 = vmatprep.mubr.msk.bf16.mxu1 (%p667_p13), %vm1557_vm11, %v1554_v50 }
 0x645   : >> { %v1310_v40 = vpop.f32.mrf.mxu0 }
 0x702   : >> { %v897_v41 = vpop.f32.mrf.mxu1 }
 0x703   : >> { %v903_v43 = vadd.f32 %v1546_v1, %v897_v41  }
 0x704   : >> { %v1315_v44 = vpop.f32.mrf.mxu1  ;;  %669 = sbr.rel (!%p667_p13) target bundleno = 693 (0x2b5), region = 144 }
 0x705   : >> { %v1925_v1 = vmov %v903_v43  ;;  %v1803_v47 = vadd.f32 (%p667_p13), %v903_v43, %v1736_v42  ;;  %v1442_v42 = vld [vmem:[%s1912_s10 + $0x18] sm:$0xff] (%p667_p13)  }
 0x706   : >> { %v900_v45 = vpop.f32.mrf.mxu1  ;;  %1326 = vmatpush3.bf16.msra.mxu1 (%p667_p13), %v1442_v42 }
 0x707   : > { %v905_v48 = vsel (%p667_p13), %vm446_vm0, %v1803_v47, 0.0  ;;  %1327 = vmatprep.subr.bf16.mxu1 (%p667_p13), %v1554_v50 }
 0x708   : >> { %v1316_v46 = vpop.f32.mrf.mxu1  ;;  %906 = vadd.xlane.f32.xlu0 (%p667_p13), %v905_v48 }
 0x70a   : > { %1328 = vmatpush3.bf16.msra.mxu1 %v1443_v51 }
 0x70b   : > { %1329 = vmatprep.subr.bf16.mxu1 %v1554_v50 }
 0x70e   : > { %1330 = vmatpush3.bf16.msra.mxu1 %v1444_v5 }
 0x70f   : > { %1331 = vmatprep.subr.bf16.mxu1 %v1554_v50 }
 0x712   : > { %1332 = vmatpush3.bf16.msra.mxu1 %v1445_v6 }
 0x791   : > { %v907_v49 = vpop.xlane.xlu0 %906 }
 0x792   : > { %v908_v52 = vmul.f32 0.03125, %v907_v49 }
 0x794   : > { %v909_v53 = vsub.f32 %v1803_v47, %v908_v52 }
 0x796   : > { %v910_v54 = vmul.f32 %v909_v53, %v909_v53 }
 0x798   : > { %v911_v55 = vsel %vm446_vm0, %v910_v54, 0.0 }
 0x799   : > { %912 = vadd.xlane.f32.xlu0 %v911_v55 }
 0x822   : > { %v913_v56 = vpop.xlane.xlu0 %912 }
 0x823   : > { %v914_v57 = vmul.f32 0.032258064, %v913_v56 }
 0x825   : > { %1446 = vrsqrt.f32 %v914_v57  ;;  %vm917_vm12 = vcmp.eq.f32.partialorder %v914_v57, inf  ;;  %v920_v60 = vand.u32 2147483648, %v914_v57  ;;  %vm919_vm13 = vcmp.eq.f32.partialorder %v914_v57, 0.0 }
 0x832   : > { %v1447_v58 = vpop.eup %1446 }
 0x833   : > { %v916_v59 = vmul.f32 %v1447_v58, %v914_v57 }
 0x835   : > { %v918_v61 = vsel %vm917_vm12, %v914_v57, %v916_v59 }
 0x836   : > { %v921_v62 = vsel %vm919_vm13, %v920_v60, %v918_v61 }
 0x837   : > { %v922_v63 = vadd.f32 1e-06, %v921_v62 }
 0x839   : > { %1448 = vrcp.f32 %v922_v63 }
 0x846   : > { %v1449_v0 = vpop.eup %1448 }
 0x847   : > { %v924_v1 = vmul.f32 %v1449_v0, %v909_v53 }
 0x849   : > { %v925_v2 = vmul.f32 %v1707_v20, %v924_v1  ;;  %v1233_v20 = vld [vmem:[%s1911_s9] ss:$0 sm:$0xff] }
 0x84b   : > { %v926_v3 = vadd.f32 %v1712_v22, %v925_v2 }
 0x84d   : > { %v927_v4 = vpack.c.bf16 %v926_v3, %v926_v3 }
 0x84f   : > { %1322 = vmatmul.mubr.msk.bf16.vlgmr.msra.gmra.mxu0 %vm446_vm0, %v927_v4 }
 0x90f   : > { %v988_v22 = vpop.f32.mrf.mxu0 }
 0x910   : > { %v989_v7 = vadd.f32 %v1233_v20, %v988_v22 }
 0x911   : > { %v1323_v8 = vpop.f32.mrf.mxu0 }
 0x912   : > { %v994_v11 = vmax.f32 %v989_v7, 0.0 }
 0x913   : > { %v991_v12 = vpop.f32.mrf.mxu0 }
 0x914   : > { %v995_v13 = vpack.c.bf16 %v994_v11, %v994_v11 }
 0x915   : > { %v1324_v50 = vpop.f32.mrf.mxu0 }
 0x916   : > { %1334 = vmatmul.mubr.msk.bf16.vlgmr.msra.gmra.mxu1 %vm1035_vm14, %v995_v13 }
 0x9d6   : > { %v1073_v15 = vpop.f32.mrf.mxu1 }
 0x9d7   : > { %v1074_v16 = vadd.f32 %v1237_v14, %v1073_v15 }
 0x9d8   : > { %v1335_v17 = vpop.f32.mrf.mxu1 }
 0x9d9   : > { %v1079_v18 = vadd.f32 %v1074_v16, %v1803_v47 }
 0x9da   : > { %v1076_v19 = vpop.f32.mrf.mxu1 }
 0x9db   : > { %1080 = vst.msk [vmem:[%s1927_s14] sm:$0xff] %vm446_vm0, %v1079_v18 }
 0x9dc   : > { %v1336_v21 = vpop.f32.mrf.mxu1 }
 0x9dd   : > { %1463 = shalt.err (!%p1460_p7)
}
 0x9de   : > { %s1464_s18 = scalar_lea.hbm %s1851_s28, 128  ;;  %s1468_s14 = scalar_lea.hbm %s1914_s12, 256 }
 0x9df   : > { %p1465_p9 = scmp.ne.s32.totalorder %s1851_s28, %s1464_s18  ;;  %p1469_p12 = scmp.lt.s32.totalorder %s1851_s28, %s1914_s12 }
 0x9e0   : > { %p1470_p13 = scmp.lt.s32.totalorder %s1468_s14, %s1464_s18 }
 0x9e1   : > { %p1466_p10 = pnand %p1465_p9, %p1664_p4 }
 0x9e2   : > { %p1471_p0 = por %p1470_p13, %p1469_p12 }
 0x9e3   : > { %p1467_p11 = pneg %p1466_p10 }
 0x9e5   : > { %p1472_p1 = pnand %p1471_p0, %p1467_p11 }
 0x9e7   : > { %1475 = shalt.err (!%p1472_p1)
}
 0x9e8   : > { %1337 = dma.vmem_to_hbm [thread:$0]  (%p1664_p4), %s1853_s19, 128, %s1851_s28, %s1082_s20  }
 0x9e9 PF: > { %p1343_p2 = scmp.ge.s32.totalorder %s1538_s26, 2  ;;  %s1108_s2 = sand.u32 1, %s1518_s21  }
 0x9ea   : > { %s1109_s3 = scalar_lea.sflag [#allocation5], %s1108_s2 }
 0x9eb   : > { %p1340_p3 = pnand %p1343_p2, %p1671_p8 }
 0x9ed   : > { %p1341_p5 = pneg %p1340_p3 }
 0x9ef   : > { %1513 = dma.done.wait (%p1341_p5), %s1109_s3, 128  }
 0x9f0   : > { %1515 = vsyncadd (%p1341_p5), %s1109_s3, 4294967168  ;;  %s25_s26 = sadd.s32 1, %s1538_s26   ;;  %s1929_s21 = smov %s1522_s22 }
 0x9f1   : > { %p22_p6 = scmp.ge.s32.totalorder %s25_s26, 4   ;;  %s1930_s22 = smov %s1526_s23 }
 0x9f2   : > { %s1931_s23 = smov %s1677_s16  ;;  %s1932_s24 = smov %s1534_s25 }
 0x9f3   : > { %s1933_s25 = smov %s1935_s29  ;;  %24 = sbr.rel (!%p22_p6) target bundleno = 8 (0x8), region = 155 }
 0x9f8   :  { %1114 = vsyncpa [#allocation5], 1 }
 0x9f9   :  { %1116 = vsyncpa [#allocation5 + $0x1], 1 }

</bundles_post_ra>
